<compile_context>
chip_gen: v7x
topology: tpu7x:2x2x1
jax: 0.10.0
libtpu: 0.0.40
codegen_flags: <defaults>
</compile_context>

<pallas_src>
import jax
import jax.numpy as jnp
from jax.experimental import pallas as pl
from jax.experimental.pallas import tpu as pltpu


# --------------------------------------------------------------------------- #
# Kernel body (shared by both launch paths)
# --------------------------------------------------------------------------- #
def _feature_mapper_kernel(x_ref, w1_ref, b1_ref, w2_ref, b2_ref, o_ref):
    # fc1 + LeakyReLU(0.2); f32 accumulation on the MXU.
    h = jnp.dot(x_ref[...], w1_ref[...], preferred_element_type=jnp.float32)
    h = h + b1_ref[...]                      # [B, nmh] + [1, nmh]
    h = jnp.maximum(h, 0.2 * h)              # LeakyReLU(0.2): 2 VALU ops/vreg
    # fc2 + ReLU (cast intermediate to the weight dtype: no-op in f32 mode,
    # bf16 in the low-precision streaming mode).
    h = h.astype(w2_ref.dtype)
    h1 = jnp.dot(h, w2_ref[...], preferred_element_type=jnp.float32)
    h1 = h1 + b2_ref[...]                    # [B, att] + [1, att]
    o_ref[...] = jnp.maximum(h1, 0.0).astype(o_ref.dtype)


# --------------------------------------------------------------------------- #
# One-time parameter preparation (hoisted out of the per-call hot path)
# --------------------------------------------------------------------------- #
def prepare_feature_mapper_params(fc1_weight, fc1_bias, fc2_weight, fc2_bias,
                                  *, weight_dtype=None):
    """PyTorch nn.Linear stores weight as [out, in]; pre-transpose once to
    [in, out] so both matmuls are lane-dense.  Biases stay f32 (all elementwise
    work runs on f32 accumulators).  weight_dtype=jnp.bfloat16 enables the
    low-HBM-traffic path."""
    w1 = jnp.asarray(fc1_weight).T
    w2 = jnp.asarray(fc2_weight).T
    b1 = jnp.asarray(fc1_bias).reshape(1, -1).astype(jnp.float32)
    b2 = jnp.asarray(fc2_bias).reshape(1, -1).astype(jnp.float32)
    if weight_dtype is not None:
        w1 = w1.astype(weight_dtype)
        w2 = w2.astype(weight_dtype)
    return w1, b1, w2, b2


# --------------------------------------------------------------------------- #
# Launch wrapper
# --------------------------------------------------------------------------- #
def _round_up(x, m):
    return ((x + m - 1) // m) * m


def _vmem_budget_bytes():
    """VMEM budget derived from the actual chip (64 MiB/TC on v7x, 128 MiB on
    v5e/v6e), with headroom for compiler scratch."""
    cap = 64 * 1024 * 1024
    try:
        info = pltpu.get_tpu_info()
        cap = int(getattr(info, "vmem_capacity_bytes", cap))
    except Exception:
        pass
    return max(32 * 1024 * 1024, min(int(0.7 * cap), 96 * 1024 * 1024))


def feature_mapper(x, w1, b1, w2, b2, *, block_b=None, compute_dtype=None):
    """x: [B, resSize]; w1: [resSize, nmh]; b1: [nmh]; w2: [nmh, attSize];
    b2: [attSize] (use prepare_feature_mapper_params for PyTorch-layout weights).
    compute_dtype: optional streaming dtype for x (e.g. jnp.bfloat16)."""
    out_dtype = x.dtype
    if compute_dtype is not None:
        x = x.astype(compute_dtype)

    B, res_size = x.shape
    nmh = w1.shape[1]
    att = w2.shape[1]
    b1_2d = jnp.reshape(b1, (1, nmh))
    b2_2d = jnp.reshape(b2, (1, att))

    xb = x.dtype.itemsize
    wb = w1.dtype.itemsize
    weight_bytes = (res_size * nmh + nmh * att) * wb + (nmh + att) * 4
    budget = _vmem_budget_bytes()

    # ---- small path: everything whole-array resident in VMEM ----------------
    whole_bytes = (B * res_size * xb + B * att * xb      # x, out
                   + weight_bytes
                   + B * nmh * 4 + B * att * 4)          # f32 intermediates
    if (block_b is None or B <= block_b) and int(whole_bytes * 1.25) <= budget:
        vmem = pl.BlockSpec(memory_space=pltpu.MemorySpace.VMEM)
        return pl.pallas_call(
            _feature_mapper_kernel,
            out_shape=jax.ShapeDtypeStruct((B, att), out_dtype),
            in_specs=[vmem, vmem, vmem, vmem, vmem],
            out_specs=vmem,
            compiler_params=pltpu.CompilerParams(vmem_limit_bytes=budget),
        )(x, w1, b1_2d, w2, b2_2d)

    # ---- batch-tiled path ----------------------------------------------------
    # VMEM budget per batch row: double-buffered x + out tiles, f32 h/h1.
    per_row = 2 * res_size * xb + 2 * att * xb + nmh * 4 + att * 4
    avail = budget - weight_bytes - (2 << 20)
    auto_b = max(8, min(avail // per_row, 8192))
    blk = auto_b if block_b is None else min(block_b, auto_b)
    blk = max(8, (blk // 8) * 8)
    blk = min(blk, _round_up(B, 8))

    n_tiles = pl.cdiv(B, blk)
    # Even tile count so the "parallel" batch axis splits evenly across v7x's
    # two TensorCores (harmless on single-TC v5e/v6e).  Perf-only nudge.
    if n_tiles > 1 and n_tiles % 2 == 1:
        blk = max(8, _round_up(pl.cdiv(B, n_tiles + 1), 8))
        n_tiles = pl.cdiv(B, blk)

    # Weights/biases: whole-array VMEM residents -> single-buffered, loaded once.
    resident = pl.BlockSpec(memory_space=pltpu.MemorySpace.VMEM)

    # No jnp.pad of x / no output slice: the last block may be ragged; Pallas
    # masks out-of-bounds output writes, and rows never mix in these matmuls.
    return pl.pallas_call(
        _feature_mapper_kernel,
        out_shape=jax.ShapeDtypeStruct((B, att), out_dtype),
        grid=(n_tiles,),
        in_specs=[
            pl.BlockSpec((blk, res_size), lambda i: (i, 0)),   # x tile (pipelined)
            resident,                                          # w1
            resident,                                          # b1
            resident,                                          # w2
            resident,                                          # b2
        ],
        out_specs=pl.BlockSpec((blk, att), lambda i: (i, 0)),
        compiler_params=pltpu.CompilerParams(
            dimension_semantics=("parallel",),
            vmem_limit_bytes=budget,
        ),
    )(x, w1, b1_2d, w2, b2_2d)


# --------------------------------------------------------------------------- #
# Pure-JAX reference
# --------------------------------------------------------------------------- #
def reference(x, w1, b1, w2, b2):
    h = x @ w1 + b1.reshape(1, -1)
    h = jnp.where(h > 0, h, 0.2 * h)
    return jnp.maximum(h @ w2 + b2.reshape(1, -1), 0.0)


if __name__ == "__main__":
    # args.resSize=32, args.nmh=64, args.attSize=16; batch=8
    B, res_size, nmh, att_size = 8, 32, 64, 16

    key = jax.random.PRNGKey(0)
    kx, kw1, kb1, kw2, kb2, kx2 = jax.random.split(key, 6)

    x = jax.random.normal(kx, (B, res_size), dtype=jnp.float32)
    # PyTorch layout: nn.Linear.weight is [out_features, in_features].
    fc1_w = jax.random.normal(kw1, (nmh, res_size), dtype=jnp.float32) * 0.1
    fc1_b = jax.random.normal(kb1, (nmh,), dtype=jnp.float32) * 0.1
    fc2_w = jax.random.normal(kw2, (att_size, nmh), dtype=jnp.float32) * 0.1
    fc2_b = jax.random.normal(kb2, (att_size,), dtype=jnp.float32) * 0.1

    # One-time prep (transpose to [in, out]); kept out of the hot path.
    w1, b1, w2, b2 = prepare_feature_mapper_params(fc1_w, fc1_b, fc2_w, fc2_b)

    # 1) Small-batch gridless path (all operands whole in VMEM).
    out = jax.block_until_ready(feature_mapper(x, w1, b1, w2, b2))
    ref = reference(x, w1, b1, w2, b2)
    assert out.shape == (B, att_size)
    assert jnp.allclose(out, ref, atol=1e-5, rtol=1e-5), "small-path mismatch"

    # 2) Batch-tiled path: parallel batch grid, resident single-buffered
    #    weights, ragged last block (no wrapper pad / slice copies).
    B2 = 600
    x2 = jax.random.normal(kx2, (B2, res_size), dtype=jnp.float32)
    out2 = jax.block_until_ready(feature_mapper(x2, w1, b1, w2, b2, block_b=256))
    ref2 = reference(x2, w1, b1, w2, b2)
    assert out2.shape == (B2, att_size)
    assert jnp.allclose(out2, ref2, atol=1e-5, rtol=1e-5), "tiled-path mismatch"

    # 3) bf16 streaming path: halves HBM traffic for x; f32 accumulation.
    w1h, b1h, w2h, b2h = prepare_feature_mapper_params(
        fc1_w, fc1_b, fc2_w, fc2_b, weight_dtype=jnp.bfloat16)
    out3 = jax.block_until_ready(
        feature_mapper(x2, w1h, b1h, w2h, b2h, block_b=256,
                       compute_dtype=jnp.bfloat16))
    assert out3.shape == (B2, att_size) and out3.dtype == x2.dtype
    assert jnp.allclose(out3, ref2, atol=1e-1, rtol=1e-1), "bf16-path mismatch"

    print("KERNEL_OK")
</pallas_src>

<mosaic_0001>
module attributes {stable_mosaic.version = 11 : i64} {
  func.func @_feature_mapper_kernel(%arg0: memref<8x32xf32, #tpu.memory_space<vmem>>, %arg1: memref<32x64xf32, #tpu.memory_space<vmem>>, %arg2: memref<1x64xf32, #tpu.memory_space<vmem>>, %arg3: memref<64x16xf32, #tpu.memory_space<vmem>>, %arg4: memref<1x16xf32, #tpu.memory_space<vmem>>, %arg5: memref<8x16xf32, #tpu.memory_space<vmem>>) attributes {dimension_semantics = [], scalar_prefetch = 0 : i64, scratch_operands = 0 : i64, tpu.core_type = #tpu.core_type<tc>} {
    %c0 = arith.constant 0 : index
    %c0_0 = arith.constant 0 : index
    %0 = vector.load %arg0[%c0, %c0_0] : memref<8x32xf32, #tpu.memory_space<vmem>>, vector<8x32xf32>
    %c0_1 = arith.constant 0 : index
    %c0_2 = arith.constant 0 : index
    %1 = vector.load %arg1[%c0_1, %c0_2] : memref<32x64xf32, #tpu.memory_space<vmem>>, vector<32x64xf32>
    %cst = arith.constant dense<0.000000e+00> : vector<8x64xf32>
    %2 = tpu.matmul %0, %1, %cst {dimension_numbers = #tpu.dot_dimension_numbers<[1], [0], [0], [1], [0, 0, 1, 1], [], []>} : vector<8x32xf32>, vector<32x64xf32>, vector<8x64xf32> -> vector<8x64xf32>
    %c0_3 = arith.constant 0 : index
    %c0_4 = arith.constant 0 : index
    %3 = vector.load %arg2[%c0_3, %c0_4] : memref<1x64xf32, #tpu.memory_space<vmem>>, vector<1x64xf32>
    %4 = vector.broadcast %3 : vector<1x64xf32> to vector<8x64xf32>
    %5 = arith.addf %2, %4 : vector<8x64xf32>
    %cst_5 = arith.constant 2.000000e-01 : f32
    %6 = vector.broadcast %cst_5 : f32 to vector<8x64xf32>
    %7 = arith.mulf %6, %5 : vector<8x64xf32>
    %8 = arith.maximumf %5, %7 : vector<8x64xf32>
    %c0_6 = arith.constant 0 : index
    %c0_7 = arith.constant 0 : index
    %9 = vector.load %arg3[%c0_6, %c0_7] : memref<64x16xf32, #tpu.memory_space<vmem>>, vector<64x16xf32>
    %cst_8 = arith.constant dense<0.000000e+00> : vector<8x16xf32>
    %10 = tpu.matmul %8, %9, %cst_8 {dimension_numbers = #tpu.dot_dimension_numbers<[1], [0], [0], [1], [0, 0, 1, 1], [], []>} : vector<8x64xf32>, vector<64x16xf32>, vector<8x16xf32> -> vector<8x16xf32>
    %c0_9 = arith.constant 0 : index
    %c0_10 = arith.constant 0 : index
    %11 = vector.load %arg4[%c0_9, %c0_10] : memref<1x16xf32, #tpu.memory_space<vmem>>, vector<1x16xf32>
    %12 = vector.broadcast %11 : vector<1x16xf32> to vector<8x16xf32>
    %13 = arith.addf %10, %12 : vector<8x16xf32>
    %cst_11 = arith.constant 0.000000e+00 : f32
    %14 = vector.broadcast %cst_11 : f32 to vector<8x16xf32>
    %15 = arith.maximumf %13, %14 : vector<8x16xf32>
    %c0_12 = arith.constant 0 : index
    %c0_13 = arith.constant 0 : index
    %16 = vector.load %arg5[%c0_12, %c0_13] : memref<8x16xf32, #tpu.memory_space<vmem>>, vector<8x16xf32>
    tpu.vector_store %arg5[%c0_12, %c0_13], %15 {strides = array<i32>} : memref<8x16xf32, #tpu.memory_space<vmem>>, vector<8x16xf32>,
    return
  }
}

</mosaic_0001>

<bundles_post_ra>
// kernel: tpu_custom_call.1
= control target key start
LH: loop header
LB: loop body
LE: loop exit
PB: predicated region body
PF: predicated region fallthrough
CT: control target
= control target key end

     0   :  { %v309_v3 = vmov 0.0|0.0   ;;  %vm310_vm0 = vmmov 0   ;;  %v311_v6 = vmov 0.0   ;;  %s400_s0 = inlined_call_operand.vmem [shape: f32[8,32], index: 0, kind: input, shape index: {}]   ;;  %s401_s1 = inlined_call_operand.vmem [shape: f32[32,64], index: 1, kind: input, shape index: {}]   ;;  %s402_s2 = inlined_call_operand.vmem [shape: f32[1,64], index: 2, kind: input, shape index: {}]   ;;  %s403_s3 = inlined_call_operand.vmem [shape: f32[64,16], index: 3, kind: input, shape index: {}]   ;;  %s404_s4 = inlined_call_operand.vmem [shape: f32[1,16], index: 4, kind: input, shape index: {}]   ;;  %s405_s5 = inlined_call_operand.hbm [shape: f32[8,16], index: 5, kind: output, shape index: {}]  }
   0x1   :  { %v22_v0 = vld [vmem:[%s401_s1] sm:$0xff]  ;;  %v23_v1 = vld [vmem:[%s401_s1 + $0x8] sm:$0xff]  ;;  %v24_v2 = vld [vmem:[%s401_s1 + $0x10] sm:$0xff]  ;;  %263 = vmatprep.subr.bf16.mxu0 %v309_v3  ;;  %241 = vmatprep.mubr.msk.f32.mxu0 %vm310_vm0, %v311_v6 }
   0x2   :  { %v264_v4 = vpack.c.bf16 %v23_v1, %v22_v0  ;;  %v25_v5 = vld [vmem:[%s401_s1 + $0x18] sm:$0xff]  ;;  %v109_v7 = vld [vmem:[%s403_s3] sm:$0xff]  ;;  %269 = vmatprep.subr.bf16.mxu1 %v309_v3  ;;  %v110_v8 = vld [vmem:[%s403_s3 + $0x8] sm:$0xff]  ;;  %260 = vmatprep.mubr.msk.f32.mxu1 %vm310_vm0, %v311_v6 }
   0x3   :  { %v111_v9 = vld [vmem:[%s403_s3 + $0x10] sm:$0xff]  ;;  %v112_v10 = vld [vmem:[%s403_s3 + $0x18] sm:$0xff]  ;;  %v267_v11 = vpack.c.bf16 %v25_v5, %v24_v2  ;;  %v270_v12 = vpack.c.bf16 %v110_v8, %v109_v7 }
   0x4   :  { %265 = vmatpush3.bf16.msra.mxu0 %v264_v4 }
   0x5   :  { %10 = vsyncpa [#allocation3], 0  ;;  %266 = vmatprep.subr.bf16.mxu0 %v309_v3  ;;  %271 = vmatpush3.bf16.msra.mxu1 %v270_v12  ;;  %v273_v13 = vpack.c.bf16 %v112_v10, %v111_v9  ;;  %v21_v14 = vld [vmem:[%s400_s0] sm:$0xff]  ;;  %vm33_vm1 = vcmask 261120   ;;  %v114_v16 = vld [vmem:[%s403_s3 + $0x28] sm:$0xff]  ;;  %vm124_vm2 = vcmask 523264  }
   0x6   :  { %272 = vmatprep.subr.bf16.mxu1 %v309_v3  ;;  %v113_v15 = vld [vmem:[%s403_s3 + $0x20] sm:$0xff]  ;;  %v115_v18 = vld [vmem:[%s403_s3 + $0x30] sm:$0xff]  ;;  %v116_v19 = vld [vmem:[%s403_s3 + $0x38] sm:$0xff]  ;;  %s312_s21 = smov [#allocation2]   ;;  %vm199_vm3 = vcmask 130048  }
   0x7   :  { %v276_v17 = vpack.c.bf16 %v114_v16, %v113_v15  ;;  %v279_v20 = vpack.c.bf16 %v116_v19, %v115_v18  ;;  %v215_v21 = vld [vmem:[%s402_s2] ss:$0 sm:$0xff]  ;;  %s207_s3 = sshll.u32 %s312_s21, 4  ;;  %s208_s3 = int_to_ptr.vmem [resolvable:$true] %s207_s3 }
   0x8   :  { %268 = vmatpush3.bf16.msra.mxu0 %v267_v11  ;;  %v217_v27 = vld [vmem:[%s404_s4] ss:$0 sm:$0xff]  ;;  %s285_s2 = scalar_lea.vmem %s208_s3, 128  ;;  %p290_p1 = scmp.lt.s32.totalorder %s208_s3, %s208_s3 }
   0x9   :  { %274 = vmatpush3.bf16.msra.mxu1 %v273_v13  ;;  %p286_p0 = scmp.ne.s32.totalorder %s208_s3, %s285_s2  ;;  %p291_p2 = scmp.lt.s32.totalorder %s285_s2, %s285_s2 }
   0xa   :  { %275 = vmatprep.subr.bf16.mxu1 %v309_v3 }
   0xb   :  { %242 = vmatmul.mubr.msk.f32.vlgmr.msra.gmra.mrb[0].mxu0 %vm33_vm1, %v21_v14  ;;  %p292_p3 = por %p291_p2, %p290_p1 }
   0xd   :  { %277 = vmatpush3.bf16.msra.mxu1 %v276_v17  ;;  %p293_p4 = pnand %p292_p3, %p286_p0 }
   0xe   :  { %278 = vmatprep.subr.bf16.mxu1 %v309_v3 }
  0x11   :  { %280 = vmatpush3.bf16.msra.mxu1 %v279_v20 }
  0xde   :  { %v103_v22 = vpop.f32.mrb[0].mxu0 }
  0xdf   :  { %v104_v23 = vadd.f32 %v215_v21, %v103_v22  ;;  %v243_v24 = vpop.f32.mrb[1].mxu0 }
  0xe1   :  { %v107_v25 = vmul.f32 0.2, %v104_v23 }
  0xe3   :  { %v108_v26 = vmax.f32 %v104_v23, %v107_v25 }
  0xe5   :  { %261 = vmatmul.mubr.msk.f32.vlgmr.msra.gmra.mrb[0].mxu1 %vm124_vm2, %v108_v26 }
 0x1b8   :  { %v194_v28 = vpop.f32.mrb[0].mxu1 }
 0x1b9   :  { %v195_v29 = vadd.f32 %v217_v27, %v194_v28  ;;  %v262_v30 = vpop.f32.mrb[1].mxu1 }
 0x1bb   :  { %v198_v31 = vmax.f32 %v195_v29, 0.0 }
 0x1bd   :  { %200 = vst.msk [vmem:[#allocation2] sm:$0xff] %vm199_vm3, %v198_v31 }
 0x1be   :  { %296 = shalt.err (!%p293_p4)
}
 0x1bf   :  { %s297_s4 = scalar_lea.hbm %s405_s5, 128 }
 0x1c0   :  { %p298_p5 = scmp.ne.s32.totalorder %s405_s5, %s297_s4  ;;  %p301_p6 = scmp.lt.u32.totalorder %s297_s4, %s405_s5 }
 0x1c2   :  { %p303_p7 = pnand %p301_p6, %p298_p5 }
 0x1c4   :  { %306 = shalt.err (!%p303_p7)
}
 0x1c5   :  { %210 = dma.vmem_to_hbm [thread:$0]  %s208_s3, 128, %s405_s5, [#allocation3]  }
 0x1c6   :  { %307 = dma.done.wait [#allocation3], 128  }
 0x1c7   :  { %308 = vsyncadd [#allocation3], 4294967168 }
 0x1c8   :  { %214 = vsyncpa [#allocation3], 1 }

</bundles_post_ra>
